<compile_context>
chip_gen: v6e
topology: v6e:2x2x1
jax: 0.10.0
libtpu: 0.0.40
codegen_flags: <defaults>
</compile_context>

<pallas_src>
import jax
import jax.numpy as jnp
from jax import lax
from jax.experimental import pallas as pl
from jax.experimental.pallas import tpu as pltpu


# ----------------------------------------------------------------------------
# In-kernel helpers
# ----------------------------------------------------------------------------
def _fold_rows_to_8(x, hs, w):
    """(hs, w) f32 -> (8, w) vreg-aligned partial sums; sum(result) == sum(x).

    Pure VPU adds over 8-row tile-aligned slices (no XLU reductions on the
    common multiple-of-8 path)."""
    h8 = (hs // 8) * 8
    if h8:
        r = x[0:8]
        for a in range(1, h8 // 8):
            r = r + x[a * 8:(a + 1) * 8]
    else:
        r = jnp.zeros((8, w), jnp.float32)
    if hs % 8:                                          # ragged-H tail (rare)
        tail = jnp.sum(x[h8:], axis=0, keepdims=True)   # (1, w) sublane reduce
        sub0 = lax.broadcasted_iota(jnp.int32, (8, 1), 0) == 0
        r = r + jnp.where(sub0, tail, 0.0)
    return r


# ----------------------------------------------------------------------------
# Kernel: one (P planes x one H-strip) block -> one (8, 128) partial-sum block
# ----------------------------------------------------------------------------
def _make_matte_kernel(n_planes_blk, hs, w, n_strips, use_halo, compute_dtype):
    def kernel(*refs):
        if use_halo:
            p_ref, t_ref, p_top, p_bot, t_top, t_bot, out_ref = refs
        else:
            p_ref, t_ref, out_ref = refs

        # Replicate-padding masks: narrow (hs,1)/(1,w) vectors built once per
        # grid step and broadcast inside jnp.where.
        row = lax.broadcasted_iota(jnp.int32, (hs, 1), 0)
        col = lax.broadcasted_iota(jnp.int32, (1, w), 1)
        row_first, row_last = row == 0, row == hs - 1
        col_first, col_last = col == 0, col == w - 1

        if use_halo:
            s = pl.program_id(1)
            at_top = s == 0
            at_bot = s == n_strips - 1

        def sobel_x8(x, above, below):
            """8 * kornia-sobel-magnitude of one (hs, w) strip.

            Separable Sobel: 2 sublane + 4 lane rolls (XLU).  `above`/`below`
            are the (1, w) rows just outside the strip (already clamped to
            replicate at the global image border).  The /8 normalization is
            folded out, so eps becomes 64e-6 (exact)."""
            x_up = jnp.where(row_first, above, pltpu.roll(x, shift=1 % hs, axis=0))
            x_dn = jnp.where(row_last, below, pltpu.roll(x, shift=(hs - 1) % hs, axis=0))
            u = x_up + 2.0 * x + x_dn            # [1, 2, 1] smooth  (feeds gx)
            d = x_dn - x_up                      # [-1, 0, 1] diff   (feeds gy)
            u_l = jnp.where(col_first, u, pltpu.roll(u, shift=1 % w, axis=1))
            u_r = jnp.where(col_last, u, pltpu.roll(u, shift=(w - 1) % w, axis=1))
            d_l = jnp.where(col_first, d, pltpu.roll(d, shift=1 % w, axis=1))
            d_r = jnp.where(col_last, d, pltpu.roll(d, shift=(w - 1) % w, axis=1))
            gx = u_r - u_l                       # 8 * true gx
            gy = d_l + 2.0 * d + d_r             # 8 * true gy
            return jnp.sqrt(gx * gx + gy * gy + 6.4e-5)

        def plane_partial(k):
            p = p_ref[k].astype(compute_dtype)
            t = t_ref[k].astype(compute_dtype)
            if use_halo:
                p_abv = jnp.where(at_top, p[0:1], p_top[k][7:8].astype(compute_dtype))
                p_blw = jnp.where(at_bot, p[hs - 1:hs], p_bot[k][0:1].astype(compute_dtype))
                t_abv = jnp.where(at_top, t[0:1], t_top[k][7:8].astype(compute_dtype))
                t_blw = jnp.where(at_bot, t[hs - 1:hs], t_bot[k][0:1].astype(compute_dtype))
            else:   # single strip == full plane: replicate from the strip itself
                p_abv, p_blw = p[0:1], p[hs - 1:hs]
                t_abv, t_blw = t[0:1], t[hs - 1:hs]
            sob = jnp.abs(sobel_x8(p, p_abv, p_blw) - sobel_x8(t, t_abv, t_blw))
            plane_abs = jnp.abs(p - t) + 0.125 * sob     # single folded /8
            return _fold_rows_to_8(plane_abs.astype(jnp.float32), hs, w)

        acc_w = lax.fori_loop(
            0, n_planes_blk,
            lambda k, acc: acc + plane_partial(k),
            jnp.zeros((8, w), jnp.float32))

        # Fold (8, w) -> lane-dense (8, 128) output block, once per grid step.
        n_full = w // 128
        if n_full:
            acc8 = acc_w[:, 0:128]
            for c in range(1, n_full):
                acc8 = acc8 + acc_w[:, c * 128:(c + 1) * 128]
        else:
            acc8 = jnp.zeros((8, 128), jnp.float32)
        if w % 128:                                      # ragged-W tail (rare)
            tail = jnp.sum(acc_w[:, n_full * 128:], axis=1, keepdims=True)
            lane0 = lax.broadcasted_iota(jnp.int32, (1, 128), 1) == 0
            acc8 = acc8 + jnp.where(lane0, tail, 0.0)
        out_ref[...] = acc8

    return kernel


# ----------------------------------------------------------------------------
# Wrapper
# ----------------------------------------------------------------------------
def _vmem_limit_bytes():
    """Raise the conservative scoped-VMEM default, with headroom below the
    physical capacity (128 MiB v5e/v6e, 64 MiB v7x)."""
    try:
        cap = pltpu.get_tpu_info().vmem_capacity_bytes
    except Exception:
        cap = 64 * 1024 * 1024
    return int(min(100 * 1024 * 1024, max(32 * 1024 * 1024, (cap * 3) // 4)))


def _choose_tiling(n_planes, H, W, itemsize, strip_bytes, block_bytes):
    """Pick (strip rows, #strips, use_halo, planes/block).  Strips are
    multiple-of-8 divisors of H (blocks never run past the array edge);
    planes/block targets ~block_bytes of input per grid step."""
    use_halo = (H % 8 == 0) and (H >= 8)
    if use_halo:
        target_rows = max(8, (strip_bytes // max(W * 4, 1)) // 8 * 8)
        hs = 8
        for cand in range(8, H + 1, 8):
            if H % cand == 0 and cand <= target_rows:
                hs = cand
        # only pathologically small divisors available and the whole plane is
        # cheap anyway -> skip striping
        if hs * 4 < target_rows and H * W * 4 <= (6 << 20):
            hs = H
    else:
        hs = H                        # ragged H: single full-plane strip
    n_strips = H // hs
    use_halo = use_halo and n_strips > 1

    p_budget = max(1, block_bytes // max(hs * W * itemsize, 1))
    P = min(p_budget, n_planes)
    # make sure the (parallel) grid has >= 2 steps when there is enough work
    if n_planes > 1 and n_strips * (-(-n_planes // P)) < 2:
        P = (n_planes + 1) // 2
    # prefer a divisor of n_planes (no padding) when it is nearly as large
    best_div = 1
    for cand in range(1, P + 1):
        if n_planes % cand == 0:
            best_div = cand
    if 2 * best_div >= P:
        P = best_div
    return hs, n_strips, use_halo, P


def matte_loss(pred_pha, true_pha, *, compute_dtype=jnp.float32,
               strip_bytes=2 << 20, block_bytes=4 << 20):
    """pred_pha, true_pha: (B, C, H, W) alpha mattes.  Returns a scalar f32 loss.

    compute_dtype=jnp.bfloat16 halves the binding VPU work / VMEM footprint on
    v6e/v7x (keep f32 on v5e: no bf16 VALU).  Partial sums are always f32."""
    assert pred_pha.shape == true_pha.shape
    B, C, H, W = pred_pha.shape
    n_planes = B * C
    p2 = pred_pha.reshape(n_planes, H, W)
    t2 = true_pha.reshape(n_planes, H, W)
    itemsize = jnp.dtype(p2.dtype).itemsize

    hs, n_strips, use_halo, P = _choose_tiling(
        n_planes, H, W, itemsize, strip_bytes, block_bytes)

    # Zero-pad the plane count to a multiple of P; all-zero planes contribute
    # exactly 0 to both L1 terms (|0-0| and |sobel(0)-sobel(0)|) -> exact.
    n_pad = (-n_planes) % P
    if n_pad:
        zpad = jnp.zeros((n_pad, H, W), p2.dtype)
        p2 = jnp.concatenate([p2, zpad], axis=0)
        t2 = jnp.concatenate([t2, zpad], axis=0)
    n_total = n_planes + n_pad
    n_blocks = n_total // P

    strip_spec = pl.BlockSpec((P, hs, W), lambda i, s: (i, s, 0))
    in_specs = [strip_spec, strip_spec]
    args = [p2, t2]
    if use_halo:
        hs8, h_blocks = hs // 8, H // 8
        top_map = lambda i, s: (i, jnp.maximum(s * hs8 - 1, 0), 0)
        bot_map = lambda i, s: (i, jnp.minimum((s + 1) * hs8, h_blocks - 1), 0)
        in_specs += [pl.BlockSpec((P, 8, W), top_map),
                     pl.BlockSpec((P, 8, W), bot_map),
                     pl.BlockSpec((P, 8, W), top_map),
                     pl.BlockSpec((P, 8, W), bot_map)]
        args += [p2, p2, t2, t2]

    n_elems_pad = n_total * H * W
    cost = pl.CostEstimate(
        flops=int(60 * n_elems_pad),
        transcendentals=int(2 * n_elems_pad),
        bytes_accessed=int(2 * n_elems_pad * itemsize
                           + n_blocks * n_strips * 8 * 128 * 4))

    kernel = _make_matte_kernel(P, hs, W, n_strips, use_halo, compute_dtype)
    partials = pl.pallas_call(
        kernel,
        out_shape=jax.ShapeDtypeStruct((n_blocks, n_strips, 8, 128), jnp.float32),
        grid_spec=pltpu.PrefetchScalarGridSpec(
            num_scalar_prefetch=0,
            grid=(n_blocks, n_strips),
            in_specs=in_specs,
            out_specs=pl.BlockSpec((None, None, 8, 128),
                                   lambda i, s: (i, s, 0, 0)),
        ),
        compiler_params=pltpu.CompilerParams(
            dimension_semantics=("parallel", "parallel"),
            vmem_limit_bytes=_vmem_limit_bytes(),
        ),
        cost_estimate=cost,
    )(*args)

    # mean(|p-t|) + mean(|sobel(p)-sobel(t)|) == (sum1 + sum2) / N; padded
    # planes contribute 0, so divide by the ORIGINAL element count.
    return jnp.sum(partials) / jnp.float32(n_planes * H * W)


# ----------------------------------------------------------------------------
# Pure-JAX reference (correctness sanity check)
# ----------------------------------------------------------------------------
def _sobel_ref(x):  # x: (N, H, W) float32
    _, h, w = x.shape
    xp = jnp.pad(x, ((0, 0), (1, 1), (1, 1)), mode="edge")
    kx = jnp.array([[-1., 0., 1.], [-2., 0., 2.], [-1., 0., 1.]],
                   jnp.float32) / 8.0
    ky = kx.T
    gx = jnp.zeros_like(x)
    gy = jnp.zeros_like(x)
    for a in range(3):
        for b in range(3):
            win = xp[:, a:a + h, b:b + w]
            gx = gx + kx[a, b] * win
            gy = gy + ky[a, b] * win
    return jnp.sqrt(gx * gx + gy * gy + 1e-6)


def matte_loss_ref(pred, true):
    B, C, H, W = pred.shape
    p = pred.reshape(B * C, H, W).astype(jnp.float32)
    t = true.reshape(B * C, H, W).astype(jnp.float32)
    return jnp.mean(jnp.abs(p - t)) + jnp.mean(
        jnp.abs(_sobel_ref(p) - _sobel_ref(t)))


# ----------------------------------------------------------------------------
if __name__ == "__main__":
    key = jax.random.PRNGKey(0)
    ks = jax.random.split(key, 6)

    # 1) Basic path: 16 planes of (16, 128) -> P=8 planes/step, 2 parallel blocks.
    p1 = jax.random.uniform(ks[0], (4, 4, 16, 128), dtype=jnp.float32)
    t1 = jax.random.uniform(ks[1], (4, 4, 16, 128), dtype=jnp.float32)
    out1 = jax.block_until_ready(matte_loss(p1, t1))
    ref1 = jax.block_until_ready(matte_loss_ref(p1, t1))
    assert jnp.allclose(out1, ref1, rtol=1e-4, atol=1e-5), ("basic", out1, ref1)

    # 2) Plane-count padding path: 5 planes, P=3 -> one zero-padded plane.
    p2_ = jax.random.uniform(ks[2], (1, 5, 24, 256), dtype=jnp.float32)
    t2_ = jax.random.uniform(ks[3], (1, 5, 24, 256), dtype=jnp.float32)
    out2 = jax.block_until_ready(matte_loss(p2_, t2_))
    ref2 = jax.block_until_ready(matte_loss_ref(p2_, t2_))
    assert jnp.allclose(out2, ref2, rtol=1e-4, atol=1e-5), ("pad", out2, ref2)

    # 3) Row-strip + halo path: H=32 forced into two 16-row strips.
    p3 = jax.random.uniform(ks[4], (1, 2, 32, 128), dtype=jnp.float32)
    t3 = jax.random.uniform(ks[5], (1, 2, 32, 128), dtype=jnp.float32)
    out3 = jax.block_until_ready(matte_loss(p3, t3, strip_bytes=16 * 128 * 4))
    ref3 = jax.block_until_ready(matte_loss_ref(p3, t3))
    assert jnp.allclose(out3, ref3, rtol=1e-4, atol=1e-5), ("strips", out3, ref3)

    print("KERNEL_OK")
</pallas_src>

<mosaic_0001>
module attributes {stable_mosaic.version = 11 : i64} {
  func.func @kernel(%arg0: i32, %arg1: i32, %arg2: memref<8x16x128xf32, #tpu.memory_space<vmem>>, %arg3: memref<8x16x128xf32, #tpu.memory_space<vmem>>, %arg4: memref<1x1x8x128xf32, #tpu.memory_space<vmem>>) attributes {dimension_semantics = [#tpu.dimension_semantics<parallel>, #tpu.dimension_semantics<parallel>], iteration_bounds = array<i64: 2, 1>, scalar_prefetch = 0 : i64, scratch_operands = 0 : i64, tpu.core_type = #tpu.core_type<tc>, window_params = [{transform_indices = @transform_0, window_bounds = array<i64: 8, 16, 128>}, {transform_indices = @transform_1, window_bounds = array<i64: 8, 16, 128>}, {transform_indices = @transform_2, window_bounds = array<i64: 1, 1, 8, 128>}]} {
    %0 = tpu.iota {dimensions = array<i32: 0>} : vector<16x1xi32>
    %1 = tpu.iota {dimensions = array<i32: 1>} : vector<1x128xi32>
    %c0_i32 = arith.constant 0 : i32
    %2 = vector.broadcast %c0_i32 : i32 to vector<16x1xi32>
    %3 = arith.cmpi eq, %0, %2 : vector<16x1xi32>
    %c15_i32 = arith.constant 15 : i32
    %4 = vector.broadcast %c15_i32 : i32 to vector<16x1xi32>
    %5 = arith.cmpi eq, %0, %4 : vector<16x1xi32>
    %c0_i32_0 = arith.constant 0 : i32
    %6 = vector.broadcast %c0_i32_0 : i32 to vector<1x128xi32>
    %7 = arith.cmpi eq, %1, %6 : vector<1x128xi32>
    %c127_i32 = arith.constant 127 : i32
    %8 = vector.broadcast %c127_i32 : i32 to vector<1x128xi32>
    %9 = arith.cmpi eq, %1, %8 : vector<1x128xi32>
    %cst = arith.constant 0.000000e+00 : f32
    %10 = vector.broadcast %cst : f32 to vector<8x128xf32>
    %c0_i32_1 = arith.constant 0 : i32
    %c8_i32 = arith.constant 8 : i32
    %11 = arith.addi %c0_i32_1, %c8_i32 : i32
    %c1_i32 = arith.constant 1 : i32
    %12 = scf.for %arg5 = %c0_i32_1 to %11 step %c1_i32 iter_args(%arg6 = %10) -> (vector<8x128xf32>)  : i32 {
      %16 = arith.index_cast %arg5 : i32 to index
      %c0_6 = arith.constant 0 : index
      %c0_7 = arith.constant 0 : index
      %17 = vector.load %arg2[%16, %c0_6, %c0_7] : memref<8x16x128xf32, #tpu.memory_space<vmem>>, vector<1x16x128xf32>
      %18 = vector.shape_cast %17 : vector<1x16x128xf32> to vector<16x128xf32>
      %19 = arith.index_cast %arg5 : i32 to index
      %c0_8 = arith.constant 0 : index
      %c0_9 = arith.constant 0 : index
      %20 = vector.load %arg3[%19, %c0_8, %c0_9] : memref<8x16x128xf32, #tpu.memory_space<vmem>>, vector<1x16x128xf32>
      %21 = vector.shape_cast %20 : vector<1x16x128xf32> to vector<16x128xf32>
      %22 = vector.extract_strided_slice %18 {offsets = [0, 0], sizes = [1, 128], strides = [1, 1]} : vector<16x128xf32> to vector<1x128xf32>
      %23 = vector.extract_strided_slice %18 {offsets = [15, 0], sizes = [1, 128], strides = [1, 1]} : vector<16x128xf32> to vector<1x128xf32>
      %24 = vector.extract_strided_slice %21 {offsets = [0, 0], sizes = [1, 128], strides = [1, 1]} : vector<16x128xf32> to vector<1x128xf32>
      %25 = vector.extract_strided_slice %21 {offsets = [15, 0], sizes = [1, 128], strides = [1, 1]} : vector<16x128xf32> to vector<1x128xf32>
      %c1_i32_10 = arith.constant 1 : i32
      %26 = tpu.dynamic_rotate %18 by %c1_i32_10 dim 0 : vector<16x128xf32>, i32 -> vector<16x128xf32>
      %27 = vector.shape_cast %3 : vector<16x1xi1> to vector<16x1xi1>
      %28 = vector.broadcast %27 : vector<16x1xi1> to vector<16x128xi1>
      %29 = vector.shape_cast %22 : vector<1x128xf32> to vector<1x128xf32>
      %30 = vector.broadcast %29 : vector<1x128xf32> to vector<16x128xf32>
      %31 = arith.select %28, %30, %26 : vector<16x128xi1>, vector<16x128xf32>
      %c15_i32_11 = arith.constant 15 : i32
      %32 = tpu.dynamic_rotate %18 by %c15_i32_11 dim 0 : vector<16x128xf32>, i32 -> vector<16x128xf32>
      %33 = vector.shape_cast %5 : vector<16x1xi1> to vector<16x1xi1>
      %34 = vector.broadcast %33 : vector<16x1xi1> to vector<16x128xi1>
      %35 = vector.shape_cast %23 : vector<1x128xf32> to vector<1x128xf32>
      %36 = vector.broadcast %35 : vector<1x128xf32> to vector<16x128xf32>
      %37 = arith.select %34, %36, %32 : vector<16x128xi1>, vector<16x128xf32>
      %cst_12 = arith.constant 2.000000e+00 : f32
      %38 = vector.broadcast %cst_12 : f32 to vector<16x128xf32>
      %39 = arith.mulf %38, %18 : vector<16x128xf32>
      %40 = arith.addf %31, %39 : vector<16x128xf32>
      %41 = arith.addf %40, %37 : vector<16x128xf32>
      %42 = arith.subf %37, %31 : vector<16x128xf32>
      %c1_i32_13 = arith.constant 1 : i32
      %43 = tpu.dynamic_rotate %41 by %c1_i32_13 dim 1 : vector<16x128xf32>, i32 -> vector<16x128xf32>
      %44 = vector.shape_cast %7 : vector<1x128xi1> to vector<1x128xi1>
      %45 = vector.broadcast %44 : vector<1x128xi1> to vector<16x128xi1>
      %46 = arith.select %45, %41, %43 : vector<16x128xi1>, vector<16x128xf32>
      %c127_i32_14 = arith.constant 127 : i32
      %47 = tpu.dynamic_rotate %41 by %c127_i32_14 dim 1 : vector<16x128xf32>, i32 -> vector<16x128xf32>
      %48 = vector.shape_cast %9 : vector<1x128xi1> to vector<1x128xi1>
      %49 = vector.broadcast %48 : vector<1x128xi1> to vector<16x128xi1>
      %50 = arith.select %49, %41, %47 : vector<16x128xi1>, vector<16x128xf32>
      %c1_i32_15 = arith.constant 1 : i32
      %51 = tpu.dynamic_rotate %42 by %c1_i32_15 dim 1 : vector<16x128xf32>, i32 -> vector<16x128xf32>
      %52 = vector.shape_cast %7 : vector<1x128xi1> to vector<1x128xi1>
      %53 = vector.broadcast %52 : vector<1x128xi1> to vector<16x128xi1>
      %54 = arith.select %53, %42, %51 : vector<16x128xi1>, vector<16x128xf32>
      %c127_i32_16 = arith.constant 127 : i32
      %55 = tpu.dynamic_rotate %42 by %c127_i32_16 dim 1 : vector<16x128xf32>, i32 -> vector<16x128xf32>
      %56 = vector.shape_cast %9 : vector<1x128xi1> to vector<1x128xi1>
      %57 = vector.broadcast %56 : vector<1x128xi1> to vector<16x128xi1>
      %58 = arith.select %57, %42, %55 : vector<16x128xi1>, vector<16x128xf32>
      %59 = arith.subf %50, %46 : vector<16x128xf32>
      %cst_17 = arith.constant 2.000000e+00 : f32
      %60 = vector.broadcast %cst_17 : f32 to vector<16x128xf32>
      %61 = arith.mulf %60, %42 : vector<16x128xf32>
      %62 = arith.addf %54, %61 : vector<16x128xf32>
      %63 = arith.addf %62, %58 : vector<16x128xf32>
      %64 = arith.mulf %59, %59 : vector<16x128xf32>
      %65 = arith.mulf %63, %63 : vector<16x128xf32>
      %66 = arith.addf %64, %65 : vector<16x128xf32>
      %cst_18 = arith.constant 6.400000e-05 : f32
      %67 = vector.broadcast %cst_18 : f32 to vector<16x128xf32>
      %68 = arith.addf %66, %67 : vector<16x128xf32>
      %69 = math.sqrt %68 : vector<16x128xf32>
      %c1_i32_19 = arith.constant 1 : i32
      %70 = tpu.dynamic_rotate %21 by %c1_i32_19 dim 0 : vector<16x128xf32>, i32 -> vector<16x128xf32>
      %71 = vector.shape_cast %3 : vector<16x1xi1> to vector<16x1xi1>
      %72 = vector.broadcast %71 : vector<16x1xi1> to vector<16x128xi1>
      %73 = vector.shape_cast %24 : vector<1x128xf32> to vector<1x128xf32>
      %74 = vector.broadcast %73 : vector<1x128xf32> to vector<16x128xf32>
      %75 = arith.select %72, %74, %70 : vector<16x128xi1>, vector<16x128xf32>
      %c15_i32_20 = arith.constant 15 : i32
      %76 = tpu.dynamic_rotate %21 by %c15_i32_20 dim 0 : vector<16x128xf32>, i32 -> vector<16x128xf32>
      %77 = vector.shape_cast %5 : vector<16x1xi1> to vector<16x1xi1>
      %78 = vector.broadcast %77 : vector<16x1xi1> to vector<16x128xi1>
      %79 = vector.shape_cast %25 : vector<1x128xf32> to vector<1x128xf32>
      %80 = vector.broadcast %79 : vector<1x128xf32> to vector<16x128xf32>
      %81 = arith.select %78, %80, %76 : vector<16x128xi1>, vector<16x128xf32>
      %cst_21 = arith.constant 2.000000e+00 : f32
      %82 = vector.broadcast %cst_21 : f32 to vector<16x128xf32>
      %83 = arith.mulf %82, %21 : vector<16x128xf32>
      %84 = arith.addf %75, %83 : vector<16x128xf32>
      %85 = arith.addf %84, %81 : vector<16x128xf32>
      %86 = arith.subf %81, %75 : vector<16x128xf32>
      %c1_i32_22 = arith.constant 1 : i32
      %87 = tpu.dynamic_rotate %85 by %c1_i32_22 dim 1 : vector<16x128xf32>, i32 -> vector<16x128xf32>
      %88 = vector.shape_cast %7 : vector<1x128xi1> to vector<1x128xi1>
      %89 = vector.broadcast %88 : vector<1x128xi1> to vector<16x128xi1>
      %90 = arith.select %89, %85, %87 : vector<16x128xi1>, vector<16x128xf32>
      %c127_i32_23 = arith.constant 127 : i32
      %91 = tpu.dynamic_rotate %85 by %c127_i32_23 dim 1 : vector<16x128xf32>, i32 -> vector<16x128xf32>
      %92 = vector.shape_cast %9 : vector<1x128xi1> to vector<1x128xi1>
      %93 = vector.broadcast %92 : vector<1x128xi1> to vector<16x128xi1>
      %94 = arith.select %93, %85, %91 : vector<16x128xi1>, vector<16x128xf32>
      %c1_i32_24 = arith.constant 1 : i32
      %95 = tpu.dynamic_rotate %86 by %c1_i32_24 dim 1 : vector<16x128xf32>, i32 -> vector<16x128xf32>
      %96 = vector.shape_cast %7 : vector<1x128xi1> to vector<1x128xi1>
      %97 = vector.broadcast %96 : vector<1x128xi1> to vector<16x128xi1>
      %98 = arith.select %97, %86, %95 : vector<16x128xi1>, vector<16x128xf32>
      %c127_i32_25 = arith.constant 127 : i32
      %99 = tpu.dynamic_rotate %86 by %c127_i32_25 dim 1 : vector<16x128xf32>, i32 -> vector<16x128xf32>
      %100 = vector.shape_cast %9 : vector<1x128xi1> to vector<1x128xi1>
      %101 = vector.broadcast %100 : vector<1x128xi1> to vector<16x128xi1>
      %102 = arith.select %101, %86, %99 : vector<16x128xi1>, vector<16x128xf32>
      %103 = arith.subf %94, %90 : vector<16x128xf32>
      %cst_26 = arith.constant 2.000000e+00 : f32
      %104 = vector.broadcast %cst_26 : f32 to vector<16x128xf32>
      %105 = arith.mulf %104, %86 : vector<16x128xf32>
      %106 = arith.addf %98, %105 : vector<16x128xf32>
      %107 = arith.addf %106, %102 : vector<16x128xf32>
      %108 = arith.mulf %103, %103 : vector<16x128xf32>
      %109 = arith.mulf %107, %107 : vector<16x128xf32>
      %110 = arith.addf %108, %109 : vector<16x128xf32>
      %cst_27 = arith.constant 6.400000e-05 : f32
      %111 = vector.broadcast %cst_27 : f32 to vector<16x128xf32>
      %112 = arith.addf %110, %111 : vector<16x128xf32>
      %113 = math.sqrt %112 : vector<16x128xf32>
      %114 = arith.subf %69, %113 : vector<16x128xf32>
      %115 = math.absf %114 : vector<16x128xf32>
      %116 = arith.subf %18, %21 : vector<16x128xf32>
      %117 = math.absf %116 : vector<16x128xf32>
      %cst_28 = arith.constant 1.250000e-01 : f32
      %118 = vector.broadcast %cst_28 : f32 to vector<16x128xf32>
      %119 = arith.mulf %118, %115 : vector<16x128xf32>
      %120 = arith.addf %117, %119 : vector<16x128xf32>
      %121 = vector.extract_strided_slice %120 {offsets = [0, 0], sizes = [8, 128], strides = [1, 1]} : vector<16x128xf32> to vector<8x128xf32>
      %122 = vector.extract_strided_slice %120 {offsets = [8, 0], sizes = [8, 128], strides = [1, 1]} : vector<16x128xf32> to vector<8x128xf32>
      %123 = arith.addf %121, %122 : vector<8x128xf32>
      %124 = arith.addf %arg6, %123 : vector<8x128xf32>
      scf.yield %124 : vector<8x128xf32>
    }
    %c8_i32_2 = arith.constant 8 : i32
    %c0 = arith.constant 0 : index
    %c0_3 = arith.constant 0 : index
    %c0_4 = arith.constant 0 : index
    %c0_5 = arith.constant 0 : index
    %13 = vector.load %arg4[%c0, %c0_3, %c0_4, %c0_5] : memref<1x1x8x128xf32, #tpu.memory_space<vmem>>, vector<1x1x8x128xf32>
    %14 = vector.shape_cast %13 : vector<1x1x8x128xf32> to vector<8x128xf32>
    %15 = vector.shape_cast %12 : vector<8x128xf32> to vector<1x1x8x128xf32>
    tpu.vector_store %arg4[%c0, %c0_3, %c0_4, %c0_5], %15 {strides = array<i32>} : memref<1x1x8x128xf32, #tpu.memory_space<vmem>>, vector<1x1x8x128xf32>,
    return
  }
  func.func @transform_0(%arg0: i32, %arg1: i32) -> (i32, i32, i32) {
    %c0_i32 = arith.constant 0 : i32
    %c0_i32_0 = arith.constant 0 : i32
    return %arg0, %arg1, %c0_i32 : i32, i32, i32
  }
  func.func @transform_1(%arg0: i32, %arg1: i32) -> (i32, i32, i32) {
    %c0_i32 = arith.constant 0 : i32
    %c0_i32_0 = arith.constant 0 : i32
    return %arg0, %arg1, %c0_i32 : i32, i32, i32
  }
  func.func @transform_2(%arg0: i32, %arg1: i32) -> (i32, i32, i32, i32) {
    %c0_i32 = arith.constant 0 : i32
    %c0_i32_0 = arith.constant 0 : i32
    %c0_i32_1 = arith.constant 0 : i32
    return %arg0, %arg1, %c0_i32, %c0_i32_0 : i32, i32, i32, i32
  }
}

</mosaic_0001>

<bundles_post_ra>
// kernel: tpu_custom_call.1
= control target key start
LH: loop header
LB: loop body
LE: loop exit
PB: predicated region body
PF: predicated region fallthrough
CT: control target
= control target key end

     0   :  { %7 = vsyncpa [#allocation3], 0  ;;  %s1206_s0 = inlined_call_operand.hbm [shape: f32[16,16,128], index: 0, kind: input, shape index: {}]   ;;  %s1207_s1 = inlined_call_operand.hbm [shape: f32[16,16,128], index: 1, kind: input, shape index: {}]   ;;  %s1208_s2 = inlined_call_operand.hbm [shape: f32[2,1,8,128], index: 2, kind: output, shape index: {}]  }
   0x1   :  { %9 = vsyncpa [#allocation3 + $0x1], 0 }
   0x2   :  { %10 = vsyncpa [#allocation6], 0 }
   0x3   :  { %12 = vsyncpa [#allocation6 + $0x1], 0 }
   0x4   :  { %13 = vsyncpa [#allocation4], 0 }
   0x5   :  { %15 = vsyncpa [#allocation4 + $0x1], 0  ;;  %s883_s9 = smov 0   ;;  %s885_s10 = smov 0  }
   0x6   :  { %s887_s11 = smov 0   ;;  %s889_s12 = smov 0  }
   0x7   :  { %s891_s13 = smov 0   ;;  %s893_s14 = smov 0  }
   0x8 LB: > { %s583_s15 = sadd.s32 4294967295, %s851_s14   ;;  %s584_s16 = sadd.s32 4294967294, %s851_s14   ;;  %s851_s14 = sphi %s893_s14, %s21_s14   ;;  %s847_s13 = sphi %s891_s13, %s1221_s13   ;;  %s843_s12 = sphi %s889_s12, %s1220_s12   ;;  %s839_s11 = sphi %s887_s11, %s1219_s11   ;;  %s835_s10 = sphi %s885_s10, %s1218_s10   ;;  %s831_s9 = sphi %s883_s9, %s1217_s9  }
   0x9   : > { %s33_s17 = sadd.s32 1, %s847_s13  ;;  %s42_s18 = sadd.s32 1, %s839_s11 }
   0xa   : > { %p35_p0 = scmp.ge.s32.totalorder %s33_s17, 2  ;;  %p49_p1 = scmp.ne.s32.totalorder %s839_s11, %s835_s10 }
   0xb   : > { %p50_p2 = scmp.eq.s32.totalorder %s851_s14, 0  ;;  %p55_p3 = scmp.ne.s32.totalorder %s835_s10, %s831_s9 }
   0xc   : > { %s1223_s17 = smov (%p35_p0, %s33_s17), 0  ;;  %p56_p5 = scmp.eq.s32.totalorder %s583_s15, 0 }
   0xd   : > { %p924_p4 = por %p50_p2, %p49_p1  ;;  %s37_s20 = ssub.s32 %s847_s13, %s1223_s17 }
   0xe   : > { %p109_p6 = scmp.eq.s32.totalorder %s583_s15, 1  ;;  %p40_p7 = scmp.eq.s32.totalorder %s37_s20, 0 }
   0xf   : > { %p930_p8 = por %p56_p5, %p55_p3  ;;  %p115_p10 = scmp.eq.s32.totalorder %s584_s16, 1 }
  0x10   : > { %p934_p9 = por %p109_p6, %p49_p1  ;;  %p625_p13 = scmp.lt.s32.totalorder %s851_s14, 2 }
  0x11   : > { %s939_s23 = scalar_select %p40_p7, %s839_s11, %s42_s18  }
  0x12   : > { %p941_p11 = por %p115_p10, %p55_p3  ;;  %s948_s25 = sand.u32 1, %s839_s11  }
  0x13   : > { %s587_s26 = sshll.u32 %s948_s25, 7  ;;  %s605_s27 = sshll.u32 %s847_s13, 11 }
  0x14   : > { %s148_s30 = scalar_lea.hbm %s1206_s0, %s605_s27  ;;  %s139_s3 = scalar_lea.vmem [#allocation2], %s587_s26 }
  0x15   : > { %s149_s4 = sshll.u32 %s139_s3, 4  ;;  %p961_p0 = pnand %p625_p13, %p924_p4  ;;  %s150_s4 = int_to_ptr.vmem [resolvable:$true] %s149_s4 }
  0x16   : > { %p595_p1 = scmp.ge.s32.totalorder %s851_s14, 1  ;;  %s136_s6 = scalar_lea.sflag [#allocation3], %s948_s25 }
  0x17   : > { %p705_p2 = pneg %p961_p0  ;;  %s716_s7 = scalar_lea.vmem %s150_s4, 2048 }
  0x18   : > { %p717_p3 = scmp.ne.s32.totalorder %s150_s4, %s716_s7  ;;  %s861_s8 = smov [#allocation2]  }
  0x19   : > { %s721_s15 = sshll.u32 %s861_s8, 4  ;;  %s722_s15 = int_to_ptr.vmem [resolvable:$false] %s721_s15 }
  0x1a   : > { %p719_p5 = pnand %p717_p3, %p705_p2  ;;  %s723_s16 = scalar_lea.vmem %s722_s15, 4096 }
  0x1b   : > { %p724_p4 = scmp.lt.s32.totalorder %s150_s4, %s722_s15  ;;  %p725_p7 = scmp.lt.s32.totalorder %s723_s16, %s716_s7 }
  0x1c   : > { %p720_p6 = pneg %p719_p5 }
  0x1d   : > { %p726_p10 = por %p725_p7, %p724_p4 }
  0x1f   : > { %p727_p13 = pnand %p726_p10, %p720_p6 }
  0x21   : > { %730 = shalt.err (!%p727_p13)
}
  0x22   : > { %s862_s18 = smov 128   ;;  %s863_s19 = smov 8  }
  0x23   : > { %617 = dma.hbm_to_vmem [thread:$0]  (!%p961_p0), %s148_s30, 2048, %s150_s4, %s136_s6, %s862_s18, %s862_s18, %s863_s19  }
  0x24   : > { %p181_p3 = scmp.lt.s32.totalorder %s851_s14, 3  ;;  %s172_s29 = scalar_lea.hbm %s1207_s1, %s605_s27 }
  0x25   : > { %s163_s7 = scalar_lea.vmem [#allocation5], %s587_s26  ;;  %s160_s15 = scalar_lea.sflag [#allocation6], %s948_s25 }
  0x26   : > { %p982_p5 = pnand %p595_p1, %p181_p3  ;;  %s173_s8 = sshll.u32 %s163_s7, 4  ;;  %s174_s8 = int_to_ptr.vmem [resolvable:$true] %s173_s8 }
  0x27   : > { %s744_s16 = scalar_lea.vmem %s174_s8, 2048  ;;  %s864_s30 = smov [#allocation5]  }
  0x28   : > { %p745_p6 = scmp.ne.s32.totalorder %s174_s8, %s744_s16  ;;  %s749_s4 = sshll.u32 %s864_s30, 4  ;;  %s750_s4 = int_to_ptr.vmem [resolvable:$false] %s749_s4 }
  0x29   : > { %s751_s27 = scalar_lea.vmem %s750_s4, 4096  ;;  %p752_p10 = scmp.lt.s32.totalorder %s174_s8, %s750_s4 }
  0x2a   : > { %p747_p4 = pnand %p745_p6, %p705_p2  ;;  %p753_p1 = scmp.lt.s32.totalorder %s751_s27, %s744_s16 }
  0x2c   : > { %p748_p7 = pneg %p747_p4  ;;  %p754_p13 = por %p753_p1, %p752_p10 }
  0x2e   : > { %p755_p3 = pnand %p754_p13, %p748_p7 }
  0x30   : > { %758 = shalt.err (!%p755_p3)
}
  0x31   : > { %620 = dma.hbm_to_vmem [thread:$0]  (!%p961_p0), %s172_s29, 2048, %s174_s8, %s160_s15, %s862_s18, %s862_s18, %s863_s19  }
  0x32   : > { %185 = sbr.rel (%p982_p5) target bundleno = 271 (0x10f), region = 28  ;;  %s997_s25 = sand.u32 (!%p982_p5), 1, %s835_s10  }
  0x33   : > { %s596_s26 = sshll.u32 (!%p982_p5), %s997_s25, 7  ;;  %s188_s6 = scalar_lea.sflag (!%p982_p5), [#allocation3], %s997_s25 }
  0x34   : > { %s1001_s20 = scalar_lea.vmem (!%p982_p5), [#allocation2], %s596_s26 }
  0x37   : > { %818 = dma.done.wait (%p930_p8), %s188_s6, 2048  }
  0x38   : > { %820 = vsyncadd (%p930_p8), %s188_s6, 4294965248  ;;  %s197_s5 = scalar_lea.sflag [#allocation6], %s997_s25  ;;  %s1008_s18 = scalar_lea.vmem [#allocation5], %s596_s26 }
  0x39   : > { %822 = dma.done.wait (%p930_p8), %s197_s5, 2048  }
  0x3a   : > { %824 = vsyncadd (%p930_p8), %s197_s5, 4294965248  ;;  %s598_s19 = sshll.u32 %s997_s25, 3  ;;  %v230_v0 = vlaneseq  ;;  %v1028_v4 = vmov 0.0   ;;  %s1030_s28 = smov 0  }
  0x3b   : > { %s1026_s21 = scalar_lea.vmem [#allocation7], %s598_s19 }
  0x3c   : > { %v1015_v1 = vshrl.u32 %v230_v0, 7  ;;  %v1017_v2 = vand.u32 127, %v230_v0 }
  0x3e   : > { %v1020_v3 = vadd.s32 8, %v1015_v1  ;;  %vm235_vm0 = vcmp.eq.s32.totalorder %v1015_v1, 0  ;;  %vm239_vm1 = vcmp.eq.s32.totalorder %v1017_v2, 0  ;;  %vm240_vm2 = vcmp.eq.s32.totalorder %v1017_v2, 127 }
  0x40   : > { %vm238_vm3 = vcmp.eq.s32.totalorder %v1020_v3, 15 }
  0x41 LB: >> { %v266_v5 = vsub.s32 0, %v1015_v1  ;;  %s599_s29 = sshll.u32 %s859_s28, 4  ;;  %vm257_vm4 = vcmp.lt.s32.totalorder %v1015_v1, 1  ;;  %vm272_vm5 = vcmp.lt.s32.totalorder %v1015_v1, 7  ;;  %v281_v9 = vsub.s32 7, %v1015_v1  ;;  %s865_s8 = smov 1   ;;  %s859_s28 = sphi %s1030_s28, %s246_s28   ;;  %v855_v4 = vphi %v1028_v4, %v1215_v4  }
  0x42   : >> { %s252_s3 = scalar_lea.vmem %s1008_s18, %s599_s29 [#allocation5]  ;;  %s249_s7 = scalar_lea.vmem %s1001_s20, %s599_s29 [#allocation2] }
  0x43   : >> { %v1042_v6 = vld [vmem:[%s252_s3] sm:$0xff]  ;;  %v1044_v7 = vld [vmem:[%s252_s3 + $0x8] sm:$0xff]  ;;  %s866_s15 = smov 127   ;;  %s246_s28 = sadd.s32 1, %s859_s28  }
  0x44   : >> { %v1048_v8 = vld [vmem:[%s249_s7] sm:$0xff]  ;;  %v351_v10 = vrot.slane %v1042_v6, 7  ;;  %v352_v11 = vrot.slane %v1044_v7, 7  ;;  %v358_v12 = vrot.slane %v1042_v6, %v266_v5  ;;  %v361_v13 = vrot.slane %v1042_v6, 1  ;;  %v1055_v14 = vld [vmem:[%s249_s7 + $0x8] sm:$0xff]  ;;  %p243_p8 = scmp.ge.s32.totalorder %s246_s28, 8  }
  0x45   : >> { %v362_v15 = vrot.slane %v1044_v7, 1  ;;  %v255_v16 = vrot.slane %v1048_v8, 7  ;;  %v256_v17 = vrot.slane %v1055_v14, 7  ;;  %v267_v18 = vrot.slane %v1048_v8, %v266_v5  ;;  %s601_s16 = sshll.u32 (%p243_p8), %s843_s12, 7  ;;  %s463_s26 = sshll.u32 (%p243_p8), %s1026_s21, 4  ;;  %s464_s26 = int_to_ptr.vmem [resolvable:$true] %s463_s26 }
  0x46   : >> { %v354_v19 = vsel %vm257_vm4, %v352_v11, %v351_v10  ;;  %v270_v20 = vrot.slane %v1048_v8, 1  ;;  %v271_v21 = vrot.slane %v1055_v14, 1  ;;  %v437_v22 = vsub.f32 %v1048_v8, %v1042_v6  ;;  %s461_s27 = scalar_lea.hbm (%p243_p8), %s1208_s2, %s601_s16  ;;  %s449_s6 = scalar_lea.sflag (%p243_p8), [#allocation4], %s997_s25 }
  0x47   : >> { %v359_v23 = vsel %vm235_vm0, %v358_v12, %v354_v19  ;;  %v363_v24 = vsel %vm272_vm5, %v361_v13, %v362_v15  ;;  %v259_v25 = vsel %vm257_vm4, %v256_v17, %v255_v16  ;;  %v438_v26 = vsub.f32 %v1055_v14, %v1044_v7  ;;  %s759_s5 = scalar_lea.vmem (%p243_p8), %s464_s26, 128  ;;  %s867_s19 = smov (%p243_p8), [#allocation7]  }
  0x48   : >> { %v1075_v27 = vsub.f32 %v363_v24, %v359_v23  ;;  %v268_v28 = vsel %vm235_vm0, %v267_v18, %v259_v25  ;;  %v273_v29 = vsel %vm272_vm5, %v270_v20, %v271_v21  ;;  %v353_v31 = vsel %vm257_vm4, %v351_v10, %v352_v11  ;;  %p760_p0 = scmp.ne.s32.totalorder (%p243_p8), %s464_s26, %s759_s5  ;;  %s763_s20 = sshll.u32 (%p243_p8), %s867_s19, 4  ;;  %s764_s20 = int_to_ptr.vmem [resolvable:$false] %s763_s20 }
  0x49   : >> { %v291_v30 = vsub.f32 %v273_v29, %v268_v28  ;;  %v364_v32 = vsel %vm272_vm5, %v362_v15, %v361_v13  ;;  %v368_v33 = vrot.slane %v1044_v7, %v281_v9  ;;  %v258_v34 = vsel %vm257_vm4, %v255_v16, %v256_v17  ;;  %s765_s18 = scalar_lea.vmem (%p243_p8), %s764_s20, 256  ;;  %p766_p6 = scmp.lt.s32.totalorder (%p243_p8), %s464_s26, %s764_s20 }
  0x4a   : >> { %391 = vrot.lane.b32.xlu1 %v1075_v27, %s865_s8  ;;  %v274_v35 = vsel %vm272_vm5, %v271_v21, %v270_v20  ;;  %v282_v36 = vrot.slane %v1055_v14, %v281_v9  ;;  %v285_v37 = vmul.f32 2.0, %v1048_v8  ;;  %v286_v38 = vmul.f32 2.0, %v1055_v14  ;;  %p761_p2 = pnand (%p243_p8), %p760_p0, %p934_p9  ;;  %p767_p4 = scmp.lt.s32.totalorder (%p243_p8), %s765_s18, %s759_s5 }
  0x4b   : >> { %309 = vrot.lane.b32.xlu0 %v291_v30, %s865_s8  ;;  %v370_v39 = vsel %vm238_vm3, %v368_v33, %v364_v32  ;;  %v371_v47 = vmul.f32 2.0, %v1042_v6  ;;  %v372_v48 = vmul.f32 2.0, %v1044_v7  ;;  %v323_v59 = vmul.f32 2.0, %v291_v30 }
  0x4c   : >> { %v284_v40 = vsel %vm238_vm3, %v282_v36, %v274_v35  ;;  %v1100_v41 = vsub.f32 %v370_v39, %v353_v31  ;;  %v287_v43 = vadd.f32 %v285_v37, %v268_v28  ;;  %v288_v44 = vadd.f32 %v286_v38, %v258_v34  ;;  %p762_p5 = pneg (%p243_p8), %p761_p2  ;;  %p768_p7 = por (%p243_p8), %p767_p4, %p766_p6 }
  0x4d   : >> { %v292_v42 = vsub.f32 %v284_v40, %v258_v34  ;;  %v373_v49 = vadd.f32 %v371_v47, %v359_v23  ;;  %v374_v50 = vadd.f32 %v372_v48, %v353_v31  ;;  %v405_v34 = vmul.f32 2.0, %v1075_v27 }
  0x4e   : >> { %393 = vrot.lane.b32.xlu1 %v1100_v41, %s865_s8  ;;  %v289_v45 = vadd.f32 %v287_v43, %v273_v29  ;;  %v290_v46 = vadd.f32 %v288_v44, %v284_v40  ;;  %v406_v35 = vmul.f32 2.0, %v1100_v41  ;;  %p769_p10 = pnand (%p243_p8), %p768_p7, %p762_p5 }
  0x4f   : >> { %311 = vrot.lane.b32.xlu0 %v292_v42, %s865_s8  ;;  %v375_v51 = vadd.f32 %v373_v49, %v363_v24  ;;  %v376_v52 = vadd.f32 %v374_v50, %v370_v39  ;;  %v324_v60 = vmul.f32 2.0, %v292_v42 }
  0x52   : >> { %295 = vrot.lane.b32.xlu1 %v290_v46, %s865_s8 }
  0x53   : >> { %293 = vrot.lane.b32.xlu0 %v289_v45, %s865_s8 }
  0x56   : >> { %303 = vrot.lane.b32.xlu1 %v290_v46, %s866_s15 }
  0x57   : >> { %301 = vrot.lane.b32.xlu0 %v289_v45, %s866_s15 }
  0x5a   : >> { %317 = vrot.lane.b32.xlu1 %v292_v42, %s866_s15 }
  0x5b   : >> { %315 = vrot.lane.b32.xlu0 %v291_v30, %s866_s15 }
  0x5e   : >> { %381 = vrot.lane.b32.xlu1 %v376_v52, %s865_s8 }
  0x5f   : >> { %379 = vrot.lane.b32.xlu0 %v375_v51, %s865_s8 }
  0x62   : >> { %387 = vrot.lane.b32.xlu1 %v376_v52, %s866_s15 }
  0x63   : >> { %385 = vrot.lane.b32.xlu0 %v375_v51, %s866_s15 }
  0x66   : >> { %399 = vrot.lane.b32.xlu1 %v1100_v41, %s866_s15 }
  0x67   : >> { %397 = vrot.lane.b32.xlu0 %v1075_v27, %s866_s15 }
  0xbc   : >> { %v392_v53 = vpop.permute.xlu1 %391 }
  0xbd   : >> { %v310_v54 = vpop.permute.xlu0 %309 }
  0xbe   : >> { %v313_v63 = vsel %vm239_vm1, %v291_v30, %v310_v54 }
  0xbf   : >> { %v325_v9 = vadd.f32 %v323_v59, %v313_v63 }
  0xc0   : >> { %v394_v55 = vpop.permute.xlu1 %393 }
  0xc1   : >> { %v312_v56 = vpop.permute.xlu0 %311  ;;  %v396_v38 = vsel %vm239_vm1, %v1100_v41, %v394_v55 }
  0xc2   : >> { %v314_v0 = vsel %vm239_vm1, %v292_v42, %v312_v56  ;;  %v408_v47 = vadd.f32 %v406_v35, %v396_v38 }
  0xc3   : >> { %v326_v10 = vadd.f32 %v324_v60, %v314_v0 }
  0xc4   : >> { %v296_v58 = vpop.permute.xlu1 %295 }
  0xc5   : >> { %v294_v57 = vpop.permute.xlu0 %293  ;;  %v300_v19 = vsel %vm239_vm1, %v290_v46, %v296_v58 }
  0xc6   : >> { %v299_v11 = vsel %vm239_vm1, %v289_v45, %v294_v57 }
  0xc8   : >> { %v304_v62 = vpop.permute.xlu1 %303 }
  0xc9   : >> { %v302_v61 = vpop.permute.xlu0 %301  ;;  %v308_v12 = vsel %vm240_vm2, %v290_v46, %v304_v62 }
  0xca   : >> { %v307_v5 = vsel %vm240_vm2, %v289_v45, %v302_v61  ;;  %v322_v23 = vsub.f32 %v308_v12, %v300_v19 }
  0xcb   : >> { %v321_v16 = vsub.f32 %v307_v5, %v299_v11 }
  0xcc   : >> { %v318_v15 = vpop.permute.xlu1 %317  ;;  %v330_v32 = vmul.f32 %v322_v23, %v322_v23 }
  0xcd   : >> { %v316_v13 = vpop.permute.xlu0 %315  ;;  %v320_v18 = vsel %vm240_vm2, %v292_v42, %v318_v15  ;;  %v329_v29 = vmul.f32 %v321_v16, %v321_v16 }
  0xce   : >> { %v319_v17 = vsel %vm240_vm2, %v291_v30, %v316_v13  ;;  %v328_v21 = vadd.f32 %v326_v10, %v320_v18  ;;  %v395_v30 = vsel %vm239_vm1, %v1075_v27, %v392_v53 }
  0xcf   : >> { %v327_v20 = vadd.f32 %v325_v9, %v319_v17  ;;  %v407_v46 = vadd.f32 %v405_v34, %v395_v30  ;;  %v440_v34 = vand.u32 2147483647, %v438_v26 }
  0xd0   : >> { %v382_v28 = vpop.permute.xlu1 %381  ;;  %v332_v31 = vmul.f32 %v328_v21, %v328_v21 }
  0xd1   : >> { %v331_v24 = vmul.f32 %v327_v20, %v327_v20  ;;  %v380_v25 = vpop.permute.xlu0 %379  ;;  %v384_v45 = vsel %vm239_vm1, %v376_v52, %v382_v28 }
  0xd2   : >> { %v334_v39 = vadd.f32 %v332_v31, %v330_v32  ;;  %v383_v44 = vsel %vm239_vm1, %v375_v51, %v380_v25 }
  0xd3   : >> { %v333_v33 = vadd.f32 %v331_v24, %v329_v29 }
  0xd4   : >> { %v388_v37 = vpop.permute.xlu1 %387  ;;  %v336_v54 = vadd.f32 6.4e-05, %v334_v39 }
  0xd5   : >> { %v386_v36 = vpop.permute.xlu0 %385  ;;  %v390_v42 = vsel %vm240_vm2, %v376_v52, %v388_v37  ;;  %v335_v43 = vadd.f32 6.4e-05, %v333_v33  ;;  %v439_v33 = vand.u32 2147483647, %v437_v22 }
  0xd6   : >> { %v389_v40 = vsel %vm240_vm2, %v375_v51, %v386_v36  ;;  %v404_v49 = vsub.f32 %v390_v42, %v384_v45  ;;  %vm346_vm8 = vcmp.eq.f32.partialorder %v336_v54, inf  ;;  %vm348_vm9 = vcmp.eq.f32.partialorder %v336_v54, 0.0 }
  0xd7   : >> { %v403_v48 = vsub.f32 %v389_v40, %v383_v44  ;;  %695 = vrsqrt.f32 %v335_v43  ;;  %vm339_vm6 = vcmp.eq.f32.partialorder %v335_v43, inf  ;;  %vm341_vm7 = vcmp.eq.f32.partialorder %v335_v43, 0.0 }
  0xd8   : >> { %v400_v53 = vpop.permute.xlu1 %399  ;;  %v412_v52 = vmul.f32 %v404_v49, %v404_v49  ;;  %697 = vrsqrt.f32 %v336_v54  ;;  %v349_v15 = vand.u32 2147483648, %v336_v54 }
  0xd9   : >> { %v398_v50 = vpop.permute.xlu0 %397  ;;  %v402_v56 = vsel %vm240_vm2, %v1100_v41, %v400_v53  ;;  %v411_v58 = vmul.f32 %v403_v48, %v403_v48  ;;  %v342_v41 = vand.u32 2147483648, %v335_v43 }
  0xda   : >> { %v401_v55 = vsel %vm240_vm2, %v1075_v27, %v398_v50  ;;  %v410_v51 = vadd.f32 %v408_v47, %v402_v56 }
  0xdb   : >> { %v409_v57 = vadd.f32 %v407_v46, %v401_v55 }
  0xdc   : >> { %v414_v60 = vmul.f32 %v410_v51, %v410_v51 }
  0xdd   : >> { %v413_v59 = vmul.f32 %v409_v57, %v409_v57 }
  0xde   : >> { %v416_v62 = vadd.f32 %v414_v60, %v412_v52 }
  0xdf   : >> { %v415_v61 = vadd.f32 %v413_v59, %v411_v58 }
  0xe0   : >> { %v418_v0 = vadd.f32 6.4e-05, %v416_v62 }
  0xe1   : >> { %v417_v63 = vadd.f32 6.4e-05, %v415_v61 }
  0xe2   : >> { %vm428_vm12 = vcmp.eq.f32.partialorder %v418_v0, inf  ;;  %v431_v21 = vand.u32 2147483648, %v418_v0  ;;  %vm430_vm13 = vcmp.eq.f32.partialorder %v418_v0, 0.0 }
  0xe3   : >> { %699 = vrsqrt.f32 %v417_v63  ;;  %vm421_vm10 = vcmp.eq.f32.partialorder %v417_v63, inf  ;;  %v424_v18 = vand.u32 2147483648, %v417_v63  ;;  %vm423_vm11 = vcmp.eq.f32.partialorder %v417_v63, 0.0 }
  0xe4   : >> { %701 = vrsqrt.f32 %v418_v0  ;;  %v696_v5 = vpop.eup %695 }
  0xe5   : >> { %v698_v27 = vpop.eup %697  ;;  %v338_v9 = vmul.f32 %v696_v5, %v335_v43 }
  0xe6   : >> { %v345_v10 = vmul.f32 %v698_v27, %v336_v54 }
  0xe7   : >> { %v340_v13 = vsel %vm339_vm6, %v335_v43, %v338_v9 }
  0xe8   : >> { %v347_v17 = vsel %vm346_vm8, %v336_v54, %v345_v10  ;;  %v343_v23 = vsel %vm341_vm7, %v342_v41, %v340_v13 }
  0xe9   : >> { %v350_v28 = vsel %vm348_vm9, %v349_v15, %v347_v17 }
  0xf0   : >> { %v700_v11 = vpop.eup %699 }
  0xf1   : >> { %v702_v12 = vpop.eup %701  ;;  %v420_v16 = vmul.f32 %v700_v11, %v417_v63 }
  0xf2   : >> { %v427_v19 = vmul.f32 %v702_v12, %v418_v0 }
  0xf3   : >> { %v422_v20 = vsel %vm421_vm10, %v417_v63, %v420_v16 }
  0xf4   : >> { %v425_v24 = vsel %vm423_vm11, %v424_v18, %v422_v20  ;;  %v429_v25 = vsel %vm428_vm12, %v418_v0, %v427_v19 }
  0xf5   : >> { %v433_v29 = vsub.f32 %v343_v23, %v425_v24  ;;  %v432_v31 = vsel %vm430_vm13, %v431_v21, %v429_v25 }
  0xf6   : >> { %v434_v32 = vsub.f32 %v350_v28, %v432_v31 }
  0xf7   : >> { %v435_v30 = vand.u32 2147483647, %v433_v29 }
  0xf8   : >> { %v436_v35 = vand.u32 2147483647, %v434_v32 }
  0xf9   : >> { %v441_v36 = vmul.f32 0.125, %v435_v30 }
  0xfa   : >> { %v442_v37 = vmul.f32 0.125, %v436_v35 }
  0xfb   : >> { %v443_v38 = vadd.f32 %v441_v36, %v439_v33 }
  0xfc   : >> { %v444_v39 = vadd.f32 %v442_v37, %v440_v34 }
  0xfe   : >> { %v445_v40 = vadd.f32 %v444_v39, %v443_v38  ;;  %245 = sbr.rel (!%p243_p8) target bundleno = 65 (0x41), region = 95 }
 0x100   : >> { %v446_v42 = vadd.f32 %v855_v4, %v445_v40  }
 0x102   : >> { %v1215_v4 = vmov %v446_v42  ;;  %447 = vst [vmem:[%s1026_s21] sm:$0xff] (%p243_p8), %v446_v42 }
 0x103   : > { %772 = shalt.err (!%p769_p10)
}
 0x104   : > { %s773_s12 = scalar_lea.hbm %s461_s27, 128  ;;  %s777_s28 = scalar_lea.hbm %s1208_s2, 256 }
 0x105   : > { %p774_p1 = scmp.ne.s32.totalorder %s461_s27, %s773_s12  ;;  %p778_p8 = scmp.lt.s32.totalorder %s461_s27, %s1208_s2 }
 0x106   : > { %p779_p0 = scmp.lt.s32.totalorder %s777_s28, %s773_s12 }
 0x107   : > { %p775_p13 = pnand %p774_p1, %p934_p9 }
 0x108   : > { %p780_p2 = por %p779_p0, %p778_p8 }
 0x109   : > { %p776_p3 = pneg %p775_p13 }
 0x10b   : > { %p781_p12 = pnand %p780_p2, %p776_p3 }
 0x10d   : > { %784 = shalt.err (!%p781_p12)
}
 0x10e   : > { %612 = dma.vmem_to_hbm [thread:$0]  (%p934_p9), %s464_s26, 128, %s461_s27, %s449_s6  }
 0x10f PF: > { %s475_s7 = sand.u32 1, %s831_s9   ;;  %p1216_p5 = scmp.ge.s32.totalorder %s851_s14, 2 }
 0x110   : > { %s476_s8 = scalar_lea.sflag [#allocation4], %s475_s7 }
 0x111   : > { %p622_p6 = pnand %p1216_p5, %p941_p11 }
 0x113   : > { %p623_p4 = pneg %p622_p6 }
 0x115   : > { %826 = dma.done.wait (%p623_p4), %s476_s8, 128  }
 0x116   : > { %828 = vsyncadd (%p623_p4), %s476_s8, 4294967168  ;;  %s21_s14 = sadd.s32 1, %s851_s14   ;;  %s1217_s9 = smov %s835_s10 }
 0x117   : > { %p18_p7 = scmp.ge.s32.totalorder %s21_s14, 4   ;;  %s1218_s10 = smov %s839_s11 }
 0x118   : > { %s1219_s11 = smov %s939_s23  ;;  %s1220_s12 = smov %s847_s13 }
 0x119   : > { %s1221_s13 = smov %s1223_s17  ;;  %20 = sbr.rel (!%p18_p7) target bundleno = 8 (0x8), region = 106 }
 0x11e   :  { %481 = vsyncpa [#allocation3], 1 }
 0x11f   :  { %483 = vsyncpa [#allocation3 + $0x1], 1 }
 0x120   :  { %484 = vsyncpa [#allocation6], 1 }
 0x121   :  { %486 = vsyncpa [#allocation6 + $0x1], 1 }
 0x122   :  { %487 = vsyncpa [#allocation4], 1 }
 0x123   :  { %489 = vsyncpa [#allocation4 + $0x1], 1 }

</bundles_post_ra>
